<compile_context>
chip_gen: v7x
topology: tpu7x:2x2x1
jax: 0.10.0
libtpu: 0.0.40
codegen_flags: <defaults>
</compile_context>

<pallas_src>
import functools

import jax
import jax.numpy as jnp
from jax import lax
from jax.experimental import pallas as pl
from jax.experimental.pallas import tpu as pltpu

LANES = 128


def _round_up(n, m):
    return ((n + m - 1) // m) * m


def _sublane_packing(dtype):
    # Minimum sublane tile: f32 -> 8 rows, bf16/f16 -> 16, int8/fp8 -> 32.
    return max(8, 32 // jnp.dtype(dtype).itemsize)


def _num_chunks_for_device():
    # Only v7x-class chips have 2 TensorCores; elsewhere a chunk split is a
    # serial loop for this memory-bound kernel (pure overhead).
    try:
        kind = jax.devices()[0].device_kind.lower()
    except Exception:
        return 1
    return 2 if ("v7" in kind or "7x" in kind) else 1


def _dice_kernel(x_ref, t_ref, inter_ref, denom_ref, *, steps, tm, total):
    c = pl.program_id(0)
    k = pl.program_id(1)
    blk = c * steps + k                  # logical (unclamped) block index
    n_full = total // (tm * LANES)       # static: blocks with no invalid elems

    # Output blocks are resident across the reduction axis k -> accumulators.
    @pl.when(k == 0)
    def _init():
        inter_ref[...] = jnp.zeros_like(inter_ref)
        denom_ref[...] = jnp.zeros_like(denom_ref)

    s = jax.nn.sigmoid(x_ref[...].astype(jnp.float32))
    t = t_ref[...].astype(jnp.float32)

    def _accum(sv, tv):
        # Sublane-reduce the (tm,128) block to (1,128) and accumulate into row 0
        # of the tiny per-chunk (8,128) output block (lane-dense stores).
        inter_ref[0:1, :] += jnp.sum(sv * tv, axis=0, keepdims=True)
        denom_ref[0:1, :] += jnp.sum(sv + tv, axis=0, keepdims=True)

    @pl.when(blk < n_full)
    def _full_block():
        _accum(s, t)

    @pl.when(blk >= n_full)
    def _tail_block():
        # Only tail (and dummy clamped) blocks pay for the mask.
        start_row = blk * tm
        row_ids = lax.broadcasted_iota(jnp.int32, (tm, LANES), 0) + start_row
        col_ids = lax.broadcasted_iota(jnp.int32, (tm, LANES), 1)
        mask = row_ids * LANES + col_ids < total
        _accum(jnp.where(mask, s, 0.0), jnp.where(mask, t, 0.0))


@functools.partial(jax.jit, static_argnums=(2, 3, 4))
def _dice_loss_impl(inputs, targets, smooth, block_rows, max_chunks):
    x = inputs.reshape(-1)
    t = targets.reshape(-1)
    total = x.shape[0]

    rows = pl.cdiv(total, LANES)
    # Pad only if the flat size is not lane-aligned (uncommon).  Padded
    # elements are masked out inside the kernel, so the pad value (0) is
    # safe for every dtype.
    if rows * LANES != total:
        pad = rows * LANES - total
        x = jnp.pad(x, (0, pad))
        t = jnp.pad(t, (0, pad))

    x2 = x.reshape(rows, LANES)   # free reshape when no pad was needed
    t2 = t.reshape(rows, LANES)

    packing = max(_sublane_packing(x2.dtype), _sublane_packing(t2.dtype))
    tm = min(_round_up(block_rows, packing), _round_up(rows, packing))
    nblocks = pl.cdiv(rows, tm)
    nchunks = min(max_chunks, nblocks)
    steps = pl.cdiv(nblocks, nchunks)

    def in_index(c, k):
        # Clamp so rare "dummy" trailing steps of the last chunk never map past
        # the final block; their contribution is masked to zero in the kernel.
        return (jnp.minimum(c * steps + k, nblocks - 1), 0)

    kernel = functools.partial(_dice_kernel, steps=steps, tm=tm, total=total)

    inter_p, denom_p = pl.pallas_call(
        kernel,
        out_shape=(
            jax.ShapeDtypeStruct((nchunks * 8, LANES), jnp.float32),
            jax.ShapeDtypeStruct((nchunks * 8, LANES), jnp.float32),
        ),
        grid_spec=pltpu.PrefetchScalarGridSpec(
            num_scalar_prefetch=0,
            grid=(nchunks, steps),
            in_specs=[
                pl.BlockSpec((tm, LANES), in_index),
                pl.BlockSpec((tm, LANES), in_index),
            ],
            out_specs=[
                pl.BlockSpec((8, LANES), lambda c, k: (c, 0)),
                pl.BlockSpec((8, LANES), lambda c, k: (c, 0)),
            ],
        ),
        compiler_params=pltpu.CompilerParams(
            dimension_semantics=("parallel", "arbitrary"),
        ),
    )(x2, t2)

    # Tiny final combine (a few KiB), fused under the same jit.
    intersection = jnp.sum(inter_p)
    denom = jnp.sum(denom_p)
    dice = (2.0 * intersection + smooth) / (denom + smooth)
    return 1.0 - dice


def dice_loss(inputs, targets, smooth=1.0, block_rows=1024, max_chunks=None):
    if max_chunks is None:
        max_chunks = _num_chunks_for_device()
    return _dice_loss_impl(
        inputs, targets, float(smooth), int(block_rows), int(max_chunks)
    )


def _dice_loss_ref(inputs, targets, smooth=1.0):
    s = jax.nn.sigmoid(inputs.astype(jnp.float32)).reshape(-1)
    t = targets.astype(jnp.float32).reshape(-1)
    inter = jnp.sum(s * t)
    dice = (2.0 * inter + smooth) / (jnp.sum(s) + jnp.sum(t) + smooth)
    return 1.0 - dice


if __name__ == "__main__":
    key = jax.random.PRNGKey(0)
    k1, k2 = jax.random.split(key)
    # Typical segmentation use: logits and binary targets, NCHW.
    x = jax.random.normal(k1, (2, 4, 16, 16), dtype=jnp.float32)
    t = (jax.random.uniform(k2, (2, 4, 16, 16)) > 0.5).astype(jnp.float32)

    loss = dice_loss(x, t, smooth=1.0)
    jax.block_until_ready(loss)

    ref = _dice_loss_ref(x, t, smooth=1.0)
    assert jnp.allclose(loss, ref, rtol=1e-5, atol=1e-5), (loss, ref)
    print("KERNEL_OK")
</pallas_src>

<mosaic_0001>
module attributes {stable_mosaic.version = 11 : i64} {
  func.func @_dice_kernel(%arg0: i32, %arg1: i32, %arg2: memref<16x128xf32, #tpu.memory_space<vmem>>, %arg3: memref<16x128xf32, #tpu.memory_space<vmem>>, %arg4: memref<8x128xf32, #tpu.memory_space<vmem>>, %arg5: memref<8x128xf32, #tpu.memory_space<vmem>>) attributes {dimension_semantics = [#tpu.dimension_semantics<parallel>, #tpu.dimension_semantics<arbitrary>], iteration_bounds = array<i64: 1, 1>, scalar_prefetch = 0 : i64, scratch_operands = 0 : i64, tpu.core_type = #tpu.core_type<tc>, window_params = [{transform_indices = @transform_0, window_bounds = array<i64: 16, 128>}, {transform_indices = @transform_1, window_bounds = array<i64: 16, 128>}, {transform_indices = @transform_2, window_bounds = array<i64: 8, 128>}, {transform_indices = @transform_3, window_bounds = array<i64: 8, 128>}]} {
    %c1_i32 = arith.constant 1 : i32
    %0 = arith.muli %arg0, %c1_i32 : i32
    %1 = arith.addi %0, %arg1 : i32
    %c0_i32 = arith.constant 0 : i32
    %2 = arith.cmpi eq, %arg1, %c0_i32 : i32
    %3 = arith.extui %2 : i1 to i32
    %c0_i32_0 = arith.constant 0 : i32
    %4 = arith.cmpi ne, %3, %c0_i32_0 : i32
    scf.if %4 {
      %cst_8 = arith.constant 0.000000e+00 : f32
      %18 = vector.broadcast %cst_8 : f32 to vector<8x128xf32>
      %c0_9 = arith.constant 0 : index
      %c0_10 = arith.constant 0 : index
      %19 = vector.load %arg4[%c0_9, %c0_10] : memref<8x128xf32, #tpu.memory_space<vmem>>, vector<8x128xf32>
      tpu.vector_store %arg4[%c0_9, %c0_10], %18 {strides = array<i32>} : memref<8x128xf32, #tpu.memory_space<vmem>>, vector<8x128xf32>,
      %cst_11 = arith.constant 0.000000e+00 : f32
      %20 = vector.broadcast %cst_11 : f32 to vector<8x128xf32>
      %c0_12 = arith.constant 0 : index
      %c0_13 = arith.constant 0 : index
      %21 = vector.load %arg5[%c0_12, %c0_13] : memref<8x128xf32, #tpu.memory_space<vmem>>, vector<8x128xf32>
      tpu.vector_store %arg5[%c0_12, %c0_13], %20 {strides = array<i32>} : memref<8x128xf32, #tpu.memory_space<vmem>>, vector<8x128xf32>,
    } else {
    }
    %c0 = arith.constant 0 : index
    %c0_1 = arith.constant 0 : index
    %5 = vector.load %arg2[%c0, %c0_1] : memref<16x128xf32, #tpu.memory_space<vmem>>, vector<16x128xf32>
    %6 = arith.negf %5 : vector<16x128xf32>
    %7 = math.exp %6 : vector<16x128xf32>
    %cst = arith.constant 1.000000e+00 : f32
    %8 = vector.broadcast %cst : f32 to vector<16x128xf32>
    %9 = arith.addf %8, %7 : vector<16x128xf32>
    %10 = arith.divf %8, %9 : vector<16x128xf32>
    %c0_2 = arith.constant 0 : index
    %c0_3 = arith.constant 0 : index
    %11 = vector.load %arg3[%c0_2, %c0_3] : memref<16x128xf32, #tpu.memory_space<vmem>>, vector<16x128xf32>
    %c1_i32_4 = arith.constant 1 : i32
    %12 = arith.cmpi slt, %1, %c1_i32_4 : i32
    %13 = arith.extui %12 : i1 to i32
    %c0_i32_5 = arith.constant 0 : i32
    %14 = arith.cmpi ne, %13, %c0_i32_5 : i32
    scf.if %14 {
      %c0_8 = arith.constant 0 : index
      %c0_9 = arith.constant 0 : index
      %18 = vector.load %arg4[%c0_8, %c0_9] : memref<8x128xf32, #tpu.memory_space<vmem>>, vector<1x128xf32>
      %19 = arith.mulf %10, %11 : vector<16x128xf32>
      %cst_10 = arith.constant dense<0.000000e+00> : vector<128xf32>
      %20 = vector.multi_reduction <add>, %19, %cst_10 [0] : vector<16x128xf32> to vector<128xf32>
      %21 = vector.shape_cast %20 : vector<128xf32> to vector<1x128xf32>
      %22 = arith.addf %18, %21 : vector<1x128xf32>
      %c0_11 = arith.constant 0 : index
      %c0_12 = arith.constant 0 : index
      %23 = vector.load %arg4[%c0_11, %c0_12] : memref<8x128xf32, #tpu.memory_space<vmem>>, vector<1x128xf32>
      tpu.vector_store %arg4[%c0_11, %c0_12], %22 {strides = array<i32>} : memref<8x128xf32, #tpu.memory_space<vmem>>, vector<1x128xf32>,
      %c0_13 = arith.constant 0 : index
      %c0_14 = arith.constant 0 : index
      %24 = vector.load %arg5[%c0_13, %c0_14] : memref<8x128xf32, #tpu.memory_space<vmem>>, vector<1x128xf32>
      %25 = arith.addf %10, %11 : vector<16x128xf32>
      %cst_15 = arith.constant dense<0.000000e+00> : vector<128xf32>
      %26 = vector.multi_reduction <add>, %25, %cst_15 [0] : vector<16x128xf32> to vector<128xf32>
      %27 = vector.shape_cast %26 : vector<128xf32> to vector<1x128xf32>
      %28 = arith.addf %24, %27 : vector<1x128xf32>
      %c0_16 = arith.constant 0 : index
      %c0_17 = arith.constant 0 : index
      %29 = vector.load %arg5[%c0_16, %c0_17] : memref<8x128xf32, #tpu.memory_space<vmem>>, vector<1x128xf32>
      tpu.vector_store %arg5[%c0_16, %c0_17], %28 {strides = array<i32>} : memref<8x128xf32, #tpu.memory_space<vmem>>, vector<1x128xf32>,
    } else {
    }
    %c1_i32_6 = arith.constant 1 : i32
    %15 = arith.cmpi sge, %1, %c1_i32_6 : i32
    %16 = arith.extui %15 : i1 to i32
    %c0_i32_7 = arith.constant 0 : i32
    %17 = arith.cmpi ne, %16, %c0_i32_7 : i32
    scf.if %17 {
      %c16_i32 = arith.constant 16 : i32
      %18 = arith.muli %1, %c16_i32 : i32
      %19 = tpu.iota {dimensions = array<i32: 0>} : vector<16x128xi32>
      %20 = vector.broadcast %18 : i32 to vector<16x128xi32>
      %21 = arith.addi %19, %20 : vector<16x128xi32>
      %22 = tpu.iota {dimensions = array<i32: 1>} : vector<16x128xi32>
      %c128_i32 = arith.constant 128 : i32
      %23 = vector.broadcast %c128_i32 : i32 to vector<16x128xi32>
      %24 = arith.muli %21, %23 : vector<16x128xi32>
      %25 = arith.addi %24, %22 : vector<16x128xi32>
      %c2048_i32 = arith.constant 2048 : i32
      %26 = vector.broadcast %c2048_i32 : i32 to vector<16x128xi32>
      %27 = arith.cmpi slt, %25, %26 : vector<16x128xi32>
      %cst_8 = arith.constant 0.000000e+00 : f32
      %28 = vector.broadcast %cst_8 : f32 to vector<16x128xf32>
      %29 = arith.select %27, %10, %28 : vector<16x128xi1>, vector<16x128xf32>
      %cst_9 = arith.constant 0.000000e+00 : f32
      %30 = vector.broadcast %cst_9 : f32 to vector<16x128xf32>
      %31 = arith.select %27, %11, %30 : vector<16x128xi1>, vector<16x128xf32>
      %c0_10 = arith.constant 0 : index
      %c0_11 = arith.constant 0 : index
      %32 = vector.load %arg4[%c0_10, %c0_11] : memref<8x128xf32, #tpu.memory_space<vmem>>, vector<1x128xf32>
      %33 = arith.mulf %29, %31 : vector<16x128xf32>
      %cst_12 = arith.constant dense<0.000000e+00> : vector<128xf32>
      %34 = vector.multi_reduction <add>, %33, %cst_12 [0] : vector<16x128xf32> to vector<128xf32>
      %35 = vector.shape_cast %34 : vector<128xf32> to vector<1x128xf32>
      %36 = arith.addf %32, %35 : vector<1x128xf32>
      %c0_13 = arith.constant 0 : index
      %c0_14 = arith.constant 0 : index
      %37 = vector.load %arg4[%c0_13, %c0_14] : memref<8x128xf32, #tpu.memory_space<vmem>>, vector<1x128xf32>
      tpu.vector_store %arg4[%c0_13, %c0_14], %36 {strides = array<i32>} : memref<8x128xf32, #tpu.memory_space<vmem>>, vector<1x128xf32>,
      %c0_15 = arith.constant 0 : index
      %c0_16 = arith.constant 0 : index
      %38 = vector.load %arg5[%c0_15, %c0_16] : memref<8x128xf32, #tpu.memory_space<vmem>>, vector<1x128xf32>
      %39 = arith.addf %29, %31 : vector<16x128xf32>
      %cst_17 = arith.constant dense<0.000000e+00> : vector<128xf32>
      %40 = vector.multi_reduction <add>, %39, %cst_17 [0] : vector<16x128xf32> to vector<128xf32>
      %41 = vector.shape_cast %40 : vector<128xf32> to vector<1x128xf32>
      %42 = arith.addf %38, %41 : vector<1x128xf32>
      %c0_18 = arith.constant 0 : index
      %c0_19 = arith.constant 0 : index
      %43 = vector.load %arg5[%c0_18, %c0_19] : memref<8x128xf32, #tpu.memory_space<vmem>>, vector<1x128xf32>
      tpu.vector_store %arg5[%c0_18, %c0_19], %42 {strides = array<i32>} : memref<8x128xf32, #tpu.memory_space<vmem>>, vector<1x128xf32>,
    } else {
    }
    return
  }
  func.func @transform_0(%arg0: i32, %arg1: i32) -> (i32, i32) {
    %c1_i32 = arith.constant 1 : i32
    %0 = arith.muli %arg0, %c1_i32 : i32
    %1 = arith.addi %0, %arg1 : i32
    %c0_i32 = arith.constant 0 : i32
    %2 = arith.minsi %1, %c0_i32 : i32
    %c0_i32_0 = arith.constant 0 : i32
    %c0_i32_1 = arith.constant 0 : i32
    return %2, %c0_i32_0 : i32, i32
  }
  func.func @transform_1(%arg0: i32, %arg1: i32) -> (i32, i32) {
    %c1_i32 = arith.constant 1 : i32
    %0 = arith.muli %arg0, %c1_i32 : i32
    %1 = arith.addi %0, %arg1 : i32
    %c0_i32 = arith.constant 0 : i32
    %2 = arith.minsi %1, %c0_i32 : i32
    %c0_i32_0 = arith.constant 0 : i32
    %c0_i32_1 = arith.constant 0 : i32
    return %2, %c0_i32_0 : i32, i32
  }
  func.func @transform_2(%arg0: i32, %arg1: i32) -> (i32, i32) {
    %c0_i32 = arith.constant 0 : i32
    %c0_i32_0 = arith.constant 0 : i32
    return %arg0, %c0_i32 : i32, i32
  }
  func.func @transform_3(%arg0: i32, %arg1: i32) -> (i32, i32) {
    %c0_i32 = arith.constant 0 : i32
    %c0_i32_0 = arith.constant 0 : i32
    return %arg0, %c0_i32 : i32, i32
  }
}

</mosaic_0001>

<bundles_post_ra>
// kernel: _dice_loss_impl.1
= control target key start
LH: loop header
LB: loop body
LE: loop exit
PB: predicated region body
PF: predicated region fallthrough
CT: control target
= control target key end

     0   :  { %v206_v0 = vmov 0.0   ;;  %s257_s2 = inlined_call_operand.vmem [shape: f32[8,128], index: 2, kind: output, shape index: {0}]   ;;  %s258_s3 = inlined_call_operand.vmem [shape: f32[8,128], index: 3, kind: output, shape index: {1}]   ;;  %s259_s0 = inlined_call_operand.vmem [shape: f32[16,128], index: 0, kind: input, shape index: {}]   ;;  %s260_s1 = inlined_call_operand.vmem [shape: f32[16,128], index: 1, kind: input, shape index: {}]  }
   0x1   :  { %82 = vst [vmem:[%s257_s2] sm:$0xff] %v206_v0  ;;  %83 = vst [vmem:[%s258_s3] sm:$0xff] %v206_v0  ;;  %v84_v1 = vld [vmem:[%s259_s0] sm:$0xff]  ;;  %v85_v2 = vld [vmem:[%s259_s0 + $0x8] sm:$0xff] }
   0x2   :  { %v195_v3 = vmul.f32 -1.442695, %v84_v1  ;;  %v196_v4 = vmul.f32 -1.442695, %v85_v2  ;;  %v98_v9 = vld [vmem:[%s260_s1] sm:$0xff]  ;;  %v99_v10 = vld [vmem:[%s260_s1 + $0x8] sm:$0xff] }
   0x4   :  { %198 = vpow2.f32 %v195_v3 }
   0x5   :  { %200 = vpow2.f32 %v196_v4 }
   0x8   :  { %v104_v29 = vld [vmem:[%s257_s2] sm:$0x1] }
   0x9   :  { %v116_v30 = vld [vmem:[%s258_s3] sm:$0x1] }
   0xe   :  { %v199_v5 = vpop.eup %198 }
   0xf   :  { %v201_v6 = vpop.eup %200  ;;  %v92_v7 = vadd.f32 1.0, %v199_v5 }
  0x10   :  { %v93_v8 = vadd.f32 1.0, %v201_v6 }
  0x11   :  { %202 = vrcp.f32 %v92_v7 }
  0x12   :  { %204 = vrcp.f32 %v93_v8 }
  0x1b   :  { %v203_v11 = vpop.eup %202 }
  0x1c   :  { %v205_v12 = vpop.eup %204  ;;  %v105_v13 = vmul.f32 %v203_v11, %v98_v9  ;;  %v117_v14 = vadd.f32 %v203_v11, %v98_v9 }
  0x1d   :  { %v106_v15 = vmul.f32 %v205_v12, %v99_v10  ;;  %v118_v16 = vadd.f32 %v205_v12, %v99_v10 }
  0x1f   :  { %v107_v17 = vadd.f32 %v106_v15, %v105_v13  ;;  %v119_v18 = vadd.f32 %v118_v16, %v117_v14 }
  0x21   :  { %v108_v19 = vrot.slane %v107_v17, 4  ;;  %v120_v20 = vrot.slane %v119_v18, 4 }
  0x23   :  { %v109_v21 = vadd.f32 %v108_v19, %v107_v17  ;;  %v121_v22 = vadd.f32 %v120_v20, %v119_v18 }
  0x25   :  { %v110_v23 = vrot.slane %v109_v21, 2  ;;  %v122_v24 = vrot.slane %v121_v22, 2 }
  0x27   :  { %v111_v25 = vadd.f32 %v110_v23, %v109_v21  ;;  %v123_v26 = vadd.f32 %v122_v24, %v121_v22 }
  0x29   :  { %v112_v27 = vrot.slane %v111_v25, 1  ;;  %v124_v28 = vrot.slane %v123_v26, 1 }
  0x2b   :  { %v113_v31 = vadd.f32 %v112_v27, %v111_v25  ;;  %v125_v32 = vadd.f32 %v124_v28, %v123_v26 }
  0x2d   :  { %v114_v33 = vadd.f32 %v113_v31, %v104_v29  ;;  %v126_v34 = vadd.f32 %v125_v32, %v116_v30 }
  0x2f   :  { %115 = vst [vmem:[%s257_s2] sm:$0x1] %v114_v33  ;;  %127 = vst [vmem:[%s258_s3] sm:$0x1] %v126_v34 }

</bundles_post_ra>
